<compile_context>
chip_gen: v7x
topology: tpu7x:2x2x1
jax: 0.10.0
libtpu: 0.0.40
codegen_flags: <defaults>
</compile_context>

<pallas_src>
import jax
import jax.numpy as jnp
from jax.experimental import pallas as pl
from jax.experimental.pallas import tpu as pltpu

IN_FEATURES = 784
HID = 128            # lane-padded hidden width (original widths 71/19/12/11)
OUT_FEATURES = 10
TILE_B_MAX = 1024    # sized so f32 x tiles (double-buffered) fit easily in VMEM


def _round_up(v, m):
    return (v + m - 1) // m * m


def mlp_kernel(x_ref,
               w0_ref, b0_ref,
               w1_ref, b1_ref,
               w2_ref, b2_ref,
               w3_ref, b3_ref,
               w4_ref,
               o_ref):
    # x tile: (TILE_B, 784) f32 from HBM; cast to bf16 in-register so the big
    # 784x128 matmul runs on the MXU bf16 path.  All matmuls accumulate in f32;
    # bias add / tanh / log-softmax stay f32 (v5e has no bf16 VPU/EUP path).
    x = x_ref[...].astype(jnp.bfloat16)

    def layer(h_bf16, w_ref, b_ref):
        acc = jnp.dot(h_bf16, w_ref[...], preferred_element_type=jnp.float32)
        return jnp.tanh(acc + b_ref[...])          # f32 (TILE_B, 128)

    h = layer(x, w0_ref, b0_ref)
    h = layer(h.astype(jnp.bfloat16), w1_ref, b1_ref)
    h = layer(h.astype(jnp.bfloat16), w2_ref, b2_ref)
    h = layer(h.astype(jnp.bfloat16), w3_ref, b3_ref)
    z = jnp.dot(h.astype(jnp.bfloat16), w4_ref[...],
                preferred_element_type=jnp.float32)  # (TILE_B, 10), no bias

    # Numerically stable LogSoftmax over dim 1 (kept at width 10 on purpose).
    m = jnp.max(z, axis=1, keepdims=True)
    s = z - m
    lse = jnp.log(jnp.sum(jnp.exp(s), axis=1, keepdims=True))
    o_ref[...] = s - lse


def linear_tanh_20_forward(x_nchw, padded_params):
    """x_nchw: [B, 1, 28, 28] f32; padded_params: output of preprocess_params."""
    B = x_nchw.shape[0]
    # Flatten only; NO dtype cast here -> x is read from HBM exactly once.
    x = x_nchw.reshape(B, IN_FEATURES)
    if x.dtype != jnp.float32:
        x = x.astype(jnp.float32)

    # Tile the batch: either one full-extent block (small B, rounded to the f32
    # sublane multiple of 8) or TILE_B_MAX-row tiles for large B.
    tile_b = min(TILE_B_MAX, _round_up(max(B, 1), 8))
    b_pad = _round_up(B, tile_b)
    if b_pad != B:
        x = jnp.pad(x, ((0, b_pad - B), (0, 0)))
    grid = (b_pad // tile_b,)

    # Weights/biases: full-array VMEM blocks, constant index_map -> fetched
    # once per call regardless of how many batch tiles the grid runs.
    weight_specs = [pl.BlockSpec(p.shape, lambda i: (0, 0)) for p in padded_params]

    # Explicit VMEM budget: double-buffered x/out tiles + (double-buffered)
    # resident weights + activation headroom, 2x margin, capped at 32 MiB
    # (safe scoped limit on v5e/v6e/v7x).
    weight_bytes = sum(int(p.size) * p.dtype.itemsize for p in padded_params)
    x_tile_bytes = tile_b * IN_FEATURES * 4        # f32 input tile
    out_tile_bytes = tile_b * OUT_FEATURES * 4     # f32 output tile
    act_bytes = tile_b * (IN_FEATURES * 2          # bf16 cast of x
                          + 4 * HID * 4            # f32 tanh activations
                          + 4 * HID * 2)           # bf16 casts for hidden matmuls
    vmem_limit = int(min(
        max(2 * (2 * (x_tile_bytes + out_tile_bytes) + 2 * weight_bytes + act_bytes),
            8 * 1024 * 1024),
        32 * 1024 * 1024))

    out = pl.pallas_call(
        mlp_kernel,
        out_shape=jax.ShapeDtypeStruct((b_pad, OUT_FEATURES), jnp.float32),
        grid=grid,
        in_specs=[pl.BlockSpec((tile_b, IN_FEATURES), lambda i: (i, 0))]
                 + weight_specs,
        out_specs=pl.BlockSpec((tile_b, OUT_FEATURES), lambda i: (i, 0)),
        compiler_params=pltpu.CompilerParams(
            dimension_semantics=("parallel",),     # batch axis -> both TCs on v7x
            vmem_limit_bytes=vmem_limit),
    )(x, *padded_params)
    return out[:B]


def init_params(key):
    """PyTorch-style uniform(-1/sqrt(fan_in), +1/sqrt(fan_in)) init (unpadded)."""
    dims = [(784, 71), (71, 19), (19, 12), (12, 11), (11, 10)]
    keys = jax.random.split(key, 2 * len(dims))
    params = []
    for i, (fan_in, fan_out) in enumerate(dims):
        bound = 1.0 / jnp.sqrt(jnp.float32(fan_in))
        w = jax.random.uniform(keys[2 * i], (fan_in, fan_out),
                               minval=-bound, maxval=bound, dtype=jnp.float32)
        params.append(w)
        if i < len(dims) - 1:   # last linear (f8) has bias=False
            b = jax.random.uniform(keys[2 * i + 1], (1, fan_out),
                                   minval=-bound, maxval=bound, dtype=jnp.float32)
            params.append(b)
    return tuple(params)


def preprocess_params(params):
    """Zero-pad hidden widths to 128 lanes; weights -> bf16, biases stay f32."""
    w0, b0, w1, b1, w2, b2, w3, b3, w4 = params

    def pad2(a, rows, cols):
        r, c = a.shape
        return jnp.pad(a, ((0, rows - r), (0, cols - c)))

    return (
        pad2(w0, IN_FEATURES, HID).astype(jnp.bfloat16),
        pad2(b0, 1, HID),
        pad2(w1, HID, HID).astype(jnp.bfloat16), pad2(b1, 1, HID),
        pad2(w2, HID, HID).astype(jnp.bfloat16), pad2(b2, 1, HID),
        pad2(w3, HID, HID).astype(jnp.bfloat16), pad2(b3, 1, HID),
        pad2(w4, HID, OUT_FEATURES).astype(jnp.bfloat16),
    )


def reference_forward(x_nchw, params):
    """Pure-JAX f32 reference matching the PyTorch module exactly (unpadded)."""
    w0, b0, w1, b1, w2, b2, w3, b3, w4 = params
    x = x_nchw.reshape(x_nchw.shape[0], IN_FEATURES).astype(jnp.float32)
    h = jnp.tanh(x @ w0 + b0)
    h = jnp.tanh(h @ w1 + b1)
    h = jnp.tanh(h @ w2 + b2)
    h = jnp.tanh(h @ w3 + b3)
    z = h @ w4
    return jax.nn.log_softmax(z, axis=1)


if __name__ == "__main__":
    key = jax.random.PRNGKey(0)
    k_x, k_p = jax.random.split(key)

    # MNIST-style input: [B, 1, 28, 28] -> 784 features
    x = jax.random.normal(k_x, (2, 1, 28, 28), dtype=jnp.float32)
    raw_params = init_params(k_p)
    padded_params = preprocess_params(raw_params)

    out = linear_tanh_20_forward(x, padded_params)
    out = jax.block_until_ready(out)

    assert out.shape == (2, 10)

    # Log-softmax rows should sum (in prob space) to ~1.
    row_sums = jnp.sum(jnp.exp(out), axis=1)
    assert jnp.allclose(row_sums, jnp.ones_like(row_sums), atol=1e-3)

    # Match the unpadded f32 reference (loose tol covers the bf16 weight /
    # activation casts inside the kernel).
    ref = reference_forward(x, raw_params)
    assert jnp.allclose(out, ref, atol=5e-2), float(jnp.max(jnp.abs(out - ref)))

    print("KERNEL_OK")
</pallas_src>

<mosaic_0001>
module attributes {stable_mosaic.version = 11 : i64} {
  func.func @mlp_kernel(%arg0: i32, %arg1: memref<8x784xf32, #tpu.memory_space<vmem>>, %arg2: memref<784x128xbf16, #tpu.memory_space<vmem>>, %arg3: memref<1x128xf32, #tpu.memory_space<vmem>>, %arg4: memref<128x128xbf16, #tpu.memory_space<vmem>>, %arg5: memref<1x128xf32, #tpu.memory_space<vmem>>, %arg6: memref<128x128xbf16, #tpu.memory_space<vmem>>, %arg7: memref<1x128xf32, #tpu.memory_space<vmem>>, %arg8: memref<128x128xbf16, #tpu.memory_space<vmem>>, %arg9: memref<1x128xf32, #tpu.memory_space<vmem>>, %arg10: memref<128x10xbf16, #tpu.memory_space<vmem>>, %arg11: memref<8x10xf32, #tpu.memory_space<vmem>>) attributes {dimension_semantics = [#tpu.dimension_semantics<parallel>], iteration_bounds = array<i64: 1>, scalar_prefetch = 0 : i64, scratch_operands = 0 : i64, tpu.core_type = #tpu.core_type<tc>, window_params = [{transform_indices = @transform_0, window_bounds = array<i64: 8, 784>}, {pipeline_mode = #tpu.pipeline_mode<synchronous>, transform_indices = @transform_1, window_bounds = array<i64: 784, 128>}, {pipeline_mode = #tpu.pipeline_mode<synchronous>, transform_indices = @transform_2, window_bounds = array<i64: 1, 128>}, {pipeline_mode = #tpu.pipeline_mode<synchronous>, transform_indices = @transform_3, window_bounds = array<i64: 128, 128>}, {pipeline_mode = #tpu.pipeline_mode<synchronous>, transform_indices = @transform_4, window_bounds = array<i64: 1, 128>}, {pipeline_mode = #tpu.pipeline_mode<synchronous>, transform_indices = @transform_5, window_bounds = array<i64: 128, 128>}, {pipeline_mode = #tpu.pipeline_mode<synchronous>, transform_indices = @transform_6, window_bounds = array<i64: 1, 128>}, {pipeline_mode = #tpu.pipeline_mode<synchronous>, transform_indices = @transform_7, window_bounds = array<i64: 128, 128>}, {pipeline_mode = #tpu.pipeline_mode<synchronous>, transform_indices = @transform_8, window_bounds = array<i64: 1, 128>}, {pipeline_mode = #tpu.pipeline_mode<synchronous>, transform_indices = @transform_9, window_bounds = array<i64: 128, 10>}, {transform_indices = @transform_10, window_bounds = array<i64: 8, 10>}]} {
    %c0 = arith.constant 0 : index
    %c0_0 = arith.constant 0 : index
    %0 = vector.load %arg1[%c0, %c0_0] : memref<8x784xf32, #tpu.memory_space<vmem>>, vector<8x784xf32>
    %1 = arith.truncf %0 : vector<8x784xf32> to vector<8x784xbf16>
    %c0_1 = arith.constant 0 : index
    %c0_2 = arith.constant 0 : index
    %2 = vector.load %arg2[%c0_1, %c0_2] : memref<784x128xbf16, #tpu.memory_space<vmem>>, vector<784x128xbf16>
    %cst = arith.constant dense<0.000000e+00> : vector<8x128xf32>
    %3 = tpu.matmul %1, %2, %cst {dimension_numbers = #tpu.dot_dimension_numbers<[1], [0], [0], [1], [0, 0, 1, 1], [], []>} : vector<8x784xbf16>, vector<784x128xbf16>, vector<8x128xf32> -> vector<8x128xf32>
    %c0_3 = arith.constant 0 : index
    %c0_4 = arith.constant 0 : index
    %4 = vector.load %arg3[%c0_3, %c0_4] : memref<1x128xf32, #tpu.memory_space<vmem>>, vector<1x128xf32>
    %5 = vector.broadcast %4 : vector<1x128xf32> to vector<8x128xf32>
    %6 = arith.addf %3, %5 : vector<8x128xf32>
    %7 = math.tanh %6 : vector<8x128xf32>
    %8 = arith.truncf %7 : vector<8x128xf32> to vector<8x128xbf16>
    %c0_5 = arith.constant 0 : index
    %c0_6 = arith.constant 0 : index
    %9 = vector.load %arg4[%c0_5, %c0_6] : memref<128x128xbf16, #tpu.memory_space<vmem>>, vector<128x128xbf16>
    %cst_7 = arith.constant dense<0.000000e+00> : vector<8x128xf32>
    %10 = tpu.matmul %8, %9, %cst_7 {dimension_numbers = #tpu.dot_dimension_numbers<[1], [0], [0], [1], [0, 0, 1, 1], [], []>} : vector<8x128xbf16>, vector<128x128xbf16>, vector<8x128xf32> -> vector<8x128xf32>
    %c0_8 = arith.constant 0 : index
    %c0_9 = arith.constant 0 : index
    %11 = vector.load %arg5[%c0_8, %c0_9] : memref<1x128xf32, #tpu.memory_space<vmem>>, vector<1x128xf32>
    %12 = vector.broadcast %11 : vector<1x128xf32> to vector<8x128xf32>
    %13 = arith.addf %10, %12 : vector<8x128xf32>
    %14 = math.tanh %13 : vector<8x128xf32>
    %15 = arith.truncf %14 : vector<8x128xf32> to vector<8x128xbf16>
    %c0_10 = arith.constant 0 : index
    %c0_11 = arith.constant 0 : index
    %16 = vector.load %arg6[%c0_10, %c0_11] : memref<128x128xbf16, #tpu.memory_space<vmem>>, vector<128x128xbf16>
    %cst_12 = arith.constant dense<0.000000e+00> : vector<8x128xf32>
    %17 = tpu.matmul %15, %16, %cst_12 {dimension_numbers = #tpu.dot_dimension_numbers<[1], [0], [0], [1], [0, 0, 1, 1], [], []>} : vector<8x128xbf16>, vector<128x128xbf16>, vector<8x128xf32> -> vector<8x128xf32>
    %c0_13 = arith.constant 0 : index
    %c0_14 = arith.constant 0 : index
    %18 = vector.load %arg7[%c0_13, %c0_14] : memref<1x128xf32, #tpu.memory_space<vmem>>, vector<1x128xf32>
    %19 = vector.broadcast %18 : vector<1x128xf32> to vector<8x128xf32>
    %20 = arith.addf %17, %19 : vector<8x128xf32>
    %21 = math.tanh %20 : vector<8x128xf32>
    %22 = arith.truncf %21 : vector<8x128xf32> to vector<8x128xbf16>
    %c0_15 = arith.constant 0 : index
    %c0_16 = arith.constant 0 : index
    %23 = vector.load %arg8[%c0_15, %c0_16] : memref<128x128xbf16, #tpu.memory_space<vmem>>, vector<128x128xbf16>
    %cst_17 = arith.constant dense<0.000000e+00> : vector<8x128xf32>
    %24 = tpu.matmul %22, %23, %cst_17 {dimension_numbers = #tpu.dot_dimension_numbers<[1], [0], [0], [1], [0, 0, 1, 1], [], []>} : vector<8x128xbf16>, vector<128x128xbf16>, vector<8x128xf32> -> vector<8x128xf32>
    %c0_18 = arith.constant 0 : index
    %c0_19 = arith.constant 0 : index
    %25 = vector.load %arg9[%c0_18, %c0_19] : memref<1x128xf32, #tpu.memory_space<vmem>>, vector<1x128xf32>
    %26 = vector.broadcast %25 : vector<1x128xf32> to vector<8x128xf32>
    %27 = arith.addf %24, %26 : vector<8x128xf32>
    %28 = math.tanh %27 : vector<8x128xf32>
    %29 = arith.truncf %28 : vector<8x128xf32> to vector<8x128xbf16>
    %c0_20 = arith.constant 0 : index
    %c0_21 = arith.constant 0 : index
    %30 = vector.load %arg10[%c0_20, %c0_21] : memref<128x10xbf16, #tpu.memory_space<vmem>>, vector<128x10xbf16>
    %cst_22 = arith.constant dense<0.000000e+00> : vector<8x10xf32>
    %31 = tpu.matmul %29, %30, %cst_22 {dimension_numbers = #tpu.dot_dimension_numbers<[1], [0], [0], [1], [0, 0, 1, 1], [], []>} : vector<8x128xbf16>, vector<128x10xbf16>, vector<8x10xf32> -> vector<8x10xf32>
    %cst_23 = arith.constant dense<0xFF800000> : vector<8xf32>
    %32 = vector.multi_reduction <maximumf>, %31, %cst_23 [1] : vector<8x10xf32> to vector<8xf32>
    %33 = vector.shape_cast %32 : vector<8xf32> to vector<8x1xf32>
    %34 = vector.broadcast %33 : vector<8x1xf32> to vector<8x10xf32>
    %35 = arith.subf %31, %34 : vector<8x10xf32>
    %36 = math.exp %35 : vector<8x10xf32>
    %cst_24 = arith.constant dense<0.000000e+00> : vector<8xf32>
    %37 = vector.multi_reduction <add>, %36, %cst_24 [1] : vector<8x10xf32> to vector<8xf32>
    %38 = vector.shape_cast %37 : vector<8xf32> to vector<8x1xf32>
    %39 = math.log %38 : vector<8x1xf32>
    %40 = vector.broadcast %39 : vector<8x1xf32> to vector<8x10xf32>
    %41 = arith.subf %35, %40 : vector<8x10xf32>
    %c0_25 = arith.constant 0 : index
    %c0_26 = arith.constant 0 : index
    %42 = vector.load %arg11[%c0_25, %c0_26] : memref<8x10xf32, #tpu.memory_space<vmem>>, vector<8x10xf32>
    tpu.vector_store %arg11[%c0_25, %c0_26], %41 {strides = array<i32>} : memref<8x10xf32, #tpu.memory_space<vmem>>, vector<8x10xf32>,
    return
  }
  func.func @transform_0(%arg0: i32) -> (i32, i32) {
    %c0_i32 = arith.constant 0 : i32
    %c0_i32_0 = arith.constant 0 : i32
    return %arg0, %c0_i32 : i32, i32
  }
  func.func @transform_1(%arg0: i32) -> (i32, i32) {
    %c0_i32 = arith.constant 0 : i32
    %c0_i32_0 = arith.constant 0 : i32
    %c0_i32_1 = arith.constant 0 : i32
    return %c0_i32, %c0_i32_0 : i32, i32
  }
  func.func @transform_2(%arg0: i32) -> (i32, i32) {
    %c0_i32 = arith.constant 0 : i32
    %c0_i32_0 = arith.constant 0 : i32
    %c0_i32_1 = arith.constant 0 : i32
    return %c0_i32, %c0_i32_0 : i32, i32
  }
  func.func @transform_3(%arg0: i32) -> (i32, i32) {
    %c0_i32 = arith.constant 0 : i32
    %c0_i32_0 = arith.constant 0 : i32
    %c0_i32_1 = arith.constant 0 : i32
    return %c0_i32, %c0_i32_0 : i32, i32
  }
  func.func @transform_4(%arg0: i32) -> (i32, i32) {
    %c0_i32 = arith.constant 0 : i32
    %c0_i32_0 = arith.constant 0 : i32
    %c0_i32_1 = arith.constant 0 : i32
    return %c0_i32, %c0_i32_0 : i32, i32
  }
  func.func @transform_5(%arg0: i32) -> (i32, i32) {
    %c0_i32 = arith.constant 0 : i32
    %c0_i32_0 = arith.constant 0 : i32
    %c0_i32_1 = arith.constant 0 : i32
    return %c0_i32, %c0_i32_0 : i32, i32
  }
  func.func @transform_6(%arg0: i32) -> (i32, i32) {
    %c0_i32 = arith.constant 0 : i32
    %c0_i32_0 = arith.constant 0 : i32
    %c0_i32_1 = arith.constant 0 : i32
    return %c0_i32, %c0_i32_0 : i32, i32
  }
  func.func @transform_7(%arg0: i32) -> (i32, i32) {
    %c0_i32 = arith.constant 0 : i32
    %c0_i32_0 = arith.constant 0 : i32
    %c0_i32_1 = arith.constant 0 : i32
    return %c0_i32, %c0_i32_0 : i32, i32
  }
  func.func @transform_8(%arg0: i32) -> (i32, i32) {
    %c0_i32 = arith.constant 0 : i32
    %c0_i32_0 = arith.constant 0 : i32
    %c0_i32_1 = arith.constant 0 : i32
    return %c0_i32, %c0_i32_0 : i32, i32
  }
  func.func @transform_9(%arg0: i32) -> (i32, i32) {
    %c0_i32 = arith.constant 0 : i32
    %c0_i32_0 = arith.constant 0 : i32
    %c0_i32_1 = arith.constant 0 : i32
    return %c0_i32, %c0_i32_0 : i32, i32
  }
  func.func @transform_10(%arg0: i32) -> (i32, i32) {
    %c0_i32 = arith.constant 0 : i32
    %c0_i32_0 = arith.constant 0 : i32
    return %arg0, %c0_i32 : i32, i32
  }
}

</mosaic_0001>

<bundles_post_ra>
// kernel: tpu_custom_call.1
= control target key start
LH: loop header
LB: loop body
LE: loop exit
PB: predicated region body
PF: predicated region fallthrough
CT: control target
= control target key end

     0   :  { %15 = vsyncpa [#allocation3], 0  ;;  %s1878_s0 = inlined_call_operand.hbm [shape: f32[8,784], index: 0, kind: input, shape index: {}]   ;;  %s1879_s1 = inlined_call_operand.hbm [shape: bf16[784,128], index: 1, kind: input, shape index: {}]   ;;  %s1880_s2 = inlined_call_operand.vmem [shape: f32[1,128], index: 2, kind: input, shape index: {}]   ;;  %s1881_s3 = inlined_call_operand.vmem [shape: bf16[128,128], index: 3, kind: input, shape index: {}]   ;;  %s1882_s4 = inlined_call_operand.vmem [shape: f32[1,128], index: 4, kind: input, shape index: {}]   ;;  %s1883_s5 = inlined_call_operand.hbm [shape: bf16[128,128], index: 5, kind: input, shape index: {}]   ;;  %s1884_s6 = inlined_call_operand.vmem [shape: f32[1,128], index: 6, kind: input, shape index: {}]   ;;  %s1885_s7 = inlined_call_operand.hbm [shape: bf16[128,128], index: 7, kind: input, shape index: {}]   ;;  %s1886_s8 = inlined_call_operand.vmem [shape: f32[1,128], index: 8, kind: input, shape index: {}]   ;;  %s1887_s9 = inlined_call_operand.vmem [shape: bf16[128,10], index: 9, kind: input, shape index: {}]   ;;  %s1888_s10 = inlined_call_operand.hbm [shape: f32[8,10], index: 10, kind: output, shape index: {}]  }
   0x1   :  { %16 = vsyncpa [#allocation6], 0 }
   0x2   :  { %17 = vsyncpa [#allocation9], 0 }
   0x3   :  { %18 = vsyncpa [#allocation4], 0  ;;  %s1639_s13 = smov [#allocation5]   ;;  %s1521_s17 = scalar_lea.hbm %s1879_s1, 6272 }
   0x4   :  { %s34_s14 = sshll.u32 %s1639_s13, 4  ;;  %p1522_p0 = scmp.ne.s32.totalorder %s1879_s1, %s1521_s17  ;;  %s35_s14 = int_to_ptr.vmem [resolvable:$true] %s34_s14 }
   0x5   :  { %p1525_p1 = scmp.lt.u32.totalorder %s1521_s17, %s1879_s1 }
   0x7   :  { %p1527_p2 = pnand %p1525_p1, %p1522_p0 }
   0x9   :  { %1530 = shalt.err (!%p1527_p2)
}
   0xa   :  { %s1531_s22 = scalar_lea.vmem %s35_s14, 6272  ;;  %p1536_p4 = scmp.lt.s32.totalorder %s35_s14, %s35_s14 }
   0xb   :  { %p1532_p3 = scmp.ne.s32.totalorder %s35_s14, %s1531_s22  ;;  %p1537_p5 = scmp.lt.s32.totalorder %s1531_s22, %s1531_s22 }
   0xd   :  { %p1538_p6 = por %p1537_p5, %p1536_p4 }
   0xf   :  { %p1539_p7 = pnand %p1538_p6, %p1532_p3 }
  0x11   :  { %1542 = shalt.err (!%p1539_p7)
}
  0x12   :  { %s1640_s23 = smov 64   ;;  %s1641_s24 = smov 4  }
  0x13   :  { %40 = dma.hbm_to_vmem [thread:$0]  %s1879_s1, 6272, %s35_s14, [#allocation6], %s1640_s23, %s1640_s23, %s1641_s24  }
  0x14   :  { %s1642_s27 = smov [#allocation2]   ;;  %s1643_s29 = smov [#allocation7]  }
  0x15   :  { %s25_s28 = sshll.u32 %s1642_s27, 4  ;;  %s52_s30 = sshll.u32 %s1643_s29, 4  ;;  %s26_s28 = int_to_ptr.vmem [resolvable:$true] %s25_s28  ;;  %s53_s30 = int_to_ptr.vmem [resolvable:$true] %s52_s30 }
  0x16   :  { %s1543_s13 = scalar_lea.hbm %s1878_s0, 896 }
  0x17   :  { %p1544_p8 = scmp.ne.s32.totalorder %s1878_s0, %s1543_s13  ;;  %p1547_p9 = scmp.lt.u32.totalorder %s1543_s13, %s1878_s0 }
  0x19   :  { %p1549_p10 = pnand %p1547_p9, %p1544_p8 }
  0x1b   :  { %1552 = shalt.err (!%p1549_p10)
}
  0x1c   :  { %s1553_s1 = scalar_lea.vmem %s26_s28, 896  ;;  %p1558_p12 = scmp.lt.s32.totalorder %s26_s28, %s26_s28 }
  0x1d   :  { %p1554_p11 = scmp.ne.s32.totalorder %s26_s28, %s1553_s1  ;;  %p1559_p13 = scmp.lt.s32.totalorder %s1553_s1, %s1553_s1 }
  0x1f   :  { %p1560_p0 = por %p1559_p13, %p1558_p12 }
  0x21   :  { %p1561_p1 = pnand %p1560_p0, %p1554_p11 }
  0x23   :  { %1564 = shalt.err (!%p1561_p1)
}
  0x24   :  { %28 = dma.hbm_to_vmem [thread:$0]  %s1878_s0, 896, %s26_s28, [#allocation3]  }
  0x25   :  { %s1565_s22 = scalar_lea.hbm %s1883_s5, 1024 }
  0x26   :  { %p1566_p2 = scmp.ne.s32.totalorder %s1883_s5, %s1565_s22  ;;  %p1569_p3 = scmp.lt.u32.totalorder %s1565_s22, %s1883_s5 }
  0x28   :  { %p1571_p4 = pnand %p1569_p3, %p1566_p2 }
  0x2a   :  { %1574 = shalt.err (!%p1571_p4)
}
  0x2b   :  { %s1575_s11 = scalar_lea.vmem %s53_s30, 1024  ;;  %p1580_p6 = scmp.lt.s32.totalorder %s53_s30, %s53_s30 }
  0x2c   :  { %p1576_p5 = scmp.ne.s32.totalorder %s53_s30, %s1575_s11  ;;  %p1581_p7 = scmp.lt.s32.totalorder %s1575_s11, %s1575_s11 }
  0x2e   :  { %p1582_p8 = por %p1581_p7, %p1580_p6 }
  0x30   :  { %p1583_p9 = pnand %p1582_p8, %p1576_p5 }
  0x32   :  { %1586 = shalt.err (!%p1583_p9)
}
  0x33   :  { %58 = dma.hbm_to_vmem [thread:$0]  %s1883_s5, 1024, %s53_s30, [#allocation6], %s1640_s23, %s1640_s23, %s1641_s24  }
  0x34   :  { %s1644_s12 = smov [#allocation8]   ;;  %s1587_s17 = scalar_lea.hbm %s1885_s7, 1024 }
  0x35   :  { %s66_s13 = sshll.u32 %s1644_s12, 4  ;;  %p1588_p10 = scmp.ne.s32.totalorder %s1885_s7, %s1587_s17  ;;  %s67_s13 = int_to_ptr.vmem [resolvable:$true] %s66_s13 }
  0x36   :  { %p1591_p11 = scmp.lt.u32.totalorder %s1587_s17, %s1885_s7 }
  0x38   :  { %p1593_p12 = pnand %p1591_p11, %p1588_p10 }
  0x3a   :  { %1596 = shalt.err (!%p1593_p12)
}
  0x3b   :  { %s1597_s20 = scalar_lea.vmem %s67_s13, 1024  ;;  %p1602_p0 = scmp.lt.s32.totalorder %s67_s13, %s67_s13 }
  0x3c   :  { %p1598_p13 = scmp.ne.s32.totalorder %s67_s13, %s1597_s20  ;;  %p1603_p1 = scmp.lt.s32.totalorder %s1597_s20, %s1597_s20 }
  0x3e   :  { %p1604_p2 = por %p1603_p1, %p1602_p0 }
  0x40   :  { %p1605_p3 = pnand %p1604_p2, %p1598_p13 }
  0x42   :  { %1608 = shalt.err (!%p1605_p3)
}
  0x43   :  { %72 = dma.hbm_to_vmem [thread:$0]  %s1885_s7, 1024, %s67_s13, [#allocation9], %s1640_s23, %s1640_s23, %s1641_s24  }
  0x44   :  { %1631 = dma.done.wait [#allocation3], 896  }
  0x45   :  { %1632 = vsyncadd [#allocation3], 4294966400 }
  0x46   :  { %1633 = dma.done.wait [#allocation6], 7296  }
  0x47   :  { %1634 = vsyncadd [#allocation6], 4294960000 }
  0x48   :  { %1635 = dma.done.wait [#allocation9], 1024  }
  0x49   :  { %1636 = vsyncadd [#allocation9], 4294966272  ;;  %v1428_v0 = vld [vmem:[#allocation5 + $0x40] sm:$0xff]   ;;  %v1432_v4 = vld [vmem:[#allocation5 + $0x48] sm:$0xff]   ;;  %v1645_v44 = vmov 0.0   ;;  %vm1646_vm0 = vmmov 0  }
  0x4a   :  { %v1429_v1 = vld [vmem:[#allocation5] sm:$0xff]   ;;  %1229 = vmatprep.subr.bf16.mxu0 %v1428_v0  ;;  %v1433_v5 = vld [vmem:[#allocation5 + $0x8] sm:$0xff]   ;;  %v1436_v8 = vld [vmem:[#allocation5 + $0x50] sm:$0xff]   ;;  %vm503_vm1 = vcmask 130048   ;;  %vm1112_vm2 = vcmask 80896  }
  0x4b   :  { %v1430_v2 = vld [vmem:[#allocation5 + $0xc0] sm:$0xff]   ;;  %1230 = vmatpush3.bf16.msra.mxu0 %v1429_v1  ;;  %v1434_v6 = vld [vmem:[#allocation5 + $0xc8] sm:$0xff]   ;;  %v1437_v9 = vld [vmem:[#allocation5 + $0x10] sm:$0xff]  }
  0x4c   :  { %v1431_v3 = vld [vmem:[#allocation5 + $0x80] sm:$0xff]   ;;  %1251 = vmatprep.subr.bf16.mxu1 %v1430_v2  ;;  %1231 = vmatprep.subr.bf16.mxu0 %v1432_v4  ;;  %v1435_v7 = vld [vmem:[#allocation5 + $0x88] sm:$0xff]   ;;  %v1438_v10 = vld [vmem:[#allocation5 + $0xd0] sm:$0xff]  }
  0x4d   :  { %1252 = vmatpush3.bf16.msra.mxu1 %v1431_v3  ;;  %v1439_v11 = vld [vmem:[#allocation5 + $0x90] sm:$0xff]   ;;  %v1440_v12 = vld [vmem:[#allocation5 + $0x58] sm:$0xff]   ;;  %v1444_v16 = vld [vmem:[#allocation5 + $0x60] sm:$0xff]  }
  0x4e   :  { %1253 = vmatprep.subr.bf16.mxu1 %v1434_v6  ;;  %v1441_v13 = vld [vmem:[#allocation5 + $0x18] sm:$0xff]   ;;  %v1445_v17 = vld [vmem:[#allocation5 + $0x20] sm:$0xff]   ;;  %v1448_v20 = vld [vmem:[#allocation5 + $0x68] sm:$0xff]  }
  0x4f   :  { %1232 = vmatpush3.bf16.msra.mxu0 %v1433_v5  ;;  %v1442_v14 = vld [vmem:[#allocation5 + $0xd8] sm:$0xff]   ;;  %v1446_v18 = vld [vmem:[#allocation5 + $0xe0] sm:$0xff]   ;;  %v1449_v21 = vld [vmem:[#allocation5 + $0x28] sm:$0xff]  }
  0x50   :  { %1233 = vmatprep.subr.bf16.mxu0 %v1436_v8  ;;  %v1443_v15 = vld [vmem:[#allocation5 + $0x98] sm:$0xff]   ;;  %v1447_v19 = vld [vmem:[#allocation5 + $0xa0] sm:$0xff]   ;;  %v1450_v22 = vld [vmem:[#allocation5 + $0xe8] sm:$0xff]  }
  0x51   :  { %1254 = vmatpush3.bf16.msra.mxu1 %v1435_v7  ;;  %v1451_v23 = vld [vmem:[#allocation5 + $0xa8] sm:$0xff]   ;;  %v1452_v24 = vld [vmem:[#allocation5 + $0x70] sm:$0xff]   ;;  %v1456_v28 = vld [vmem:[#allocation5 + $0x78] sm:$0xff]  }
  0x52   :  { %1255 = vmatprep.subr.bf16.mxu1 %v1438_v10  ;;  %v1453_v25 = vld [vmem:[#allocation5 + $0x30] sm:$0xff]   ;;  %v1457_v29 = vld [vmem:[#allocation5 + $0x38] sm:$0xff]   ;;  %v90_v34 = vld [vmem:[#allocation2] sm:$0xff] }
  0x53   :  { %1234 = vmatpush3.bf16.msra.mxu0 %v1437_v9  ;;  %v1454_v26 = vld [vmem:[#allocation5 + $0xf0] sm:$0xff]   ;;  %v1458_v30 = vld [vmem:[#allocation5 + $0xf8] sm:$0xff]   ;;  %v97_v35 = vpack.c.bf16 %v90_v34, %v90_v34  ;;  %v1460_v36 = vld [vmem:[#allocation5 + $0x140] sm:$0xff]  }
  0x54   :  { %1235 = vmatprep.subr.bf16.mxu0 %v1440_v12  ;;  %v1455_v27 = vld [vmem:[#allocation5 + $0xb0] sm:$0xff]   ;;  %v1459_v33 = vld [vmem:[#allocation5 + $0xb8] sm:$0xff]   ;;  %v93_v37 = vld [vmem:[#allocation2 + $0x18] sm:$0xff] }
  0x55   :  { %1256 = vmatpush3.bf16.msra.mxu1 %v1439_v11  ;;  %v91_v31 = vld [vmem:[#allocation2 + $0x8] sm:$0xff]  ;;  %v100_v38 = vpack.c.bf16 %v93_v37, %v93_v37  ;;  %v1461_v39 = vld [vmem:[#allocation5 + $0x100] sm:$0xff]   ;;  %v92_v40 = vld [vmem:[#allocation2 + $0x10] sm:$0xff] }
  0x56   :  { %1257 = vmatprep.subr.bf16.mxu1 %v1442_v14  ;;  %v98_v32 = vpack.c.bf16 %v91_v31, %v91_v31  ;;  %v99_v41 = vpack.c.bf16 %v92_v40, %v92_v40  ;;  %v1462_v42 = vld [vmem:[#allocation5 + $0x148] sm:$0xff]   ;;  %v1464_v45 = vld [vmem:[#allocation5 + $0x150] sm:$0xff]   ;;  %v1466_v47 = vld [vmem:[#allocation5 + $0x158] sm:$0xff]  }
  0x57   :  { %1236 = vmatpush3.bf16.msra.mxu0 %v1441_v13  ;;  %579 = vmatprep.mubr.bf16.mxu1 %v100_v38  ;;  %v1463_v43 = vld [vmem:[#allocation5 + $0x108] sm:$0xff]   ;;  %v1465_v46 = vld [vmem:[#allocation5 + $0x110] sm:$0xff]   ;;  %v1467_v48 = vld [vmem:[#allocation5 + $0x118] sm:$0xff]  }
  0x58   :  { %1237 = vmatprep.subr.bf16.mxu0 %v1444_v16  ;;  %539 = vmatprep.mubr.bf16.mxu0 %v98_v32  ;;  %v1468_v49 = vld [vmem:[#allocation5 + $0x160] sm:$0xff]   ;;  %v1470_v51 = vld [vmem:[#allocation5 + $0x168] sm:$0xff]   ;;  %v95_v54 = vld [vmem:[#allocation2 + $0x28] sm:$0xff] }
  0x59   :  { %1258 = vmatpush3.bf16.msra.mxu1 %v1443_v15  ;;  %v1469_v50 = vld [vmem:[#allocation5 + $0x120] sm:$0xff]   ;;  %v1471_v52 = vld [vmem:[#allocation5 + $0x128] sm:$0xff]   ;;  %v1472_v55 = vld [vmem:[#allocation5 + $0x170] sm:$0xff]   ;;  %v102_v56 = vpack.c.bf16 %v95_v54, %v95_v54 }
  0x5a   :  { %1259 = vmatprep.subr.bf16.mxu1 %v1446_v18  ;;  %v1476_v53 = vld [vmem:[#allocation5 + $0x180] sm:$0xff]   ;;  %v96_v57 = vld [vmem:[#allocation2 + $0x30] sm:$0xff]  ;;  %v1473_v59 = vld [vmem:[#allocation5 + $0x130] sm:$0xff]  }
  0x5b   :  { %1238 = vmatpush3.bf16.msra.mxu0 %v1445_v17  ;;  %v103_v58 = vpack.c.bf16 %v96_v57, %v96_v57  ;;  %v1474_v60 = vld [vmem:[#allocation5 + $0x178] sm:$0xff]   ;;  %v94_v62 = vld [vmem:[#allocation2 + $0x20] sm:$0xff]  ;;  %v1478_v1 = vld [vmem:[%s1881_s3 + $0x8] sm:$0xff]  }
  0x5c   :  { %1239 = vmatprep.subr.bf16.mxu0 %v1448_v20  ;;  %v1475_v61 = vld [vmem:[#allocation5 + $0x138] sm:$0xff]   ;;  %v101_v63 = vpack.c.bf16 %v94_v62, %v94_v62  ;;  %v1477_v0 = vld [vmem:[%s1881_s3] sm:$0xff]   ;;  %v1480_v3 = vld [vmem:[%s1881_s3 + $0x18] sm:$0xff]  }
  0x5d   :  { %1260 = vmatpush3.bf16.msra.mxu1 %v1447_v19  ;;  %v1479_v2 = vld [vmem:[%s1881_s3 + $0x10] sm:$0xff]   ;;  %v1481_v4 = vld [vmem:[%s1881_s3 + $0x20] sm:$0xff]   ;;  %v1482_v5 = vld [vmem:[%s1881_s3 + $0x28] sm:$0xff]  }
  0x5e   :  { %1261 = vmatprep.subr.bf16.mxu1 %v1450_v22  ;;  %v1483_v6 = vld [vmem:[%s1881_s3 + $0x30] sm:$0xff]   ;;  %v1484_v7 = vld [vmem:[%s1881_s3 + $0x38] sm:$0xff]   ;;  %v1485_v8 = vld [vmem:[#allocation7] sm:$0xff]  }
  0x5f   :  { %1240 = vmatpush3.bf16.msra.mxu0 %v1449_v21  ;;  %v1486_v9 = vld [vmem:[#allocation7 + $0x8] sm:$0xff]   ;;  %v1487_v10 = vld [vmem:[#allocation7 + $0x10] sm:$0xff]   ;;  %v1488_v11 = vld [vmem:[#allocation7 + $0x18] sm:$0xff]  }
  0x60   :  { %1241 = vmatprep.subr.bf16.mxu0 %v1452_v24  ;;  %v1143_v13 = vld [vmem:[%s1880_s2] ss:$0 sm:$0xff]  ;;  %v1491_v40 = vld [vmem:[#allocation7 + $0x30] sm:$0xff]   ;;  %v1504_v62 = vld [vmem:[%s1887_s9 + $0x18] sm:$0xff]  }
  0x61   :  { %1262 = vmatpush3.bf16.msra.mxu1 %v1451_v23  ;;  %v1489_v38 = vld [vmem:[#allocation7 + $0x20] sm:$0xff]   ;;  %v1499_v57 = vld [vmem:[#allocation8 + $0x30] sm:$0xff]  }
  0x62   :  { %1263 = vmatprep.subr.bf16.mxu1 %v1454_v26 }
  0x63   :  { %1242 = vmatpush3.bf16.msra.mxu0 %v1453_v25 }
  0x64   :  { %1243 = vmatprep.subr.bf16.mxu0 %v1456_v28 }
  0x65   :  { %1264 = vmatpush3.bf16.msra.mxu1 %v1455_v27 }
  0x66   :  { %1265 = vmatprep.subr.bf16.mxu1 %v1458_v30 }
  0x67   :  { %1244 = vmatpush3.bf16.msra.mxu0 %v1457_v29 }
  0x68   :  { %1273 = vmatprep.subr.bf16.mxu0 %v1460_v36 }
  0x69   :  { %1266 = vmatpush3.bf16.msra.mxu1 %v1459_v33 }
  0x6a   :  { %540 = vmatmul.mubr.bf16.vlgmr.msra.gmra.mrb[0].mxu0 %v97_v35  ;;  %1333 = vmatprep.subr.bf16.mxu1 %v1645_v44 }
  0x6b   :  { %1274 = vmatpush3.bf16.msra.mxu0 %v1461_v39  ;;  %619 = vmatprep.mubr.bf16.mxu0 %v102_v56  ;;  %v1490_v39 = vld [vmem:[#allocation7 + $0x28] sm:$0xff]  }
  0x6c   :  { %580 = vmatmul.mubr.bf16.vlgmr.msra.gmra.mrb[0].mxu1 %v99_v41  ;;  %1275 = vmatprep.subr.bf16.mxu0 %v1462_v42  ;;  %v1492_v41 = vld [vmem:[#allocation7 + $0x38] sm:$0xff]   ;;  %v1493_v42 = vld [vmem:[#allocation8] sm:$0xff]   ;;  %v1498_v56 = vld [vmem:[#allocation8 + $0x28] sm:$0xff]  }
  0x6d   :  { %1335 = vmatprep.mubr.msk.bf16.mxu1 %vm1646_vm0, %v1645_v44  ;;  %1334 = vmatpush3.bf16.msra.mxu1 %v1476_v53 }
  0x6e   :  { %1339 = vmatprep.subr.bf16.mxu1 %v1645_v44 }
  0x6f   :  { %1276 = vmatpush3.bf16.msra.mxu0 %v1463_v43  ;;  %v1494_v43 = vld [vmem:[#allocation8 + $0x8] sm:$0xff]  }
  0x70   :  { %1277 = vmatprep.subr.bf16.mxu0 %v1464_v45  ;;  %v1495_v45 = vld [vmem:[#allocation8 + $0x10] sm:$0xff]  }
  0x73   :  { %1278 = vmatpush3.bf16.msra.mxu0 %v1465_v46  ;;  %v1496_v46 = vld [vmem:[#allocation8 + $0x18] sm:$0xff]  }
  0x74   :  { %1279 = vmatprep.subr.bf16.mxu0 %v1466_v47  ;;  %1336 = vmatmul.mubr.msk.bf16.vlgmr.msra.gmra.mrb[4].mxu1 %vm503_vm1, %v103_v58  ;;  %v1194_v47 = vld [vmem:[%s1882_s4] ss:$0 sm:$0xff]  ;;  %v1500_v58 = vld [vmem:[#allocation8 + $0x38] sm:$0xff]  }
  0x75   :  { %1355 = vmatprep.mubr.msk.bf16.mxu1 %vm1646_vm0, %v1645_v44  ;;  %1340 = vmatpush3.bf16.msra.mxu1 %v1477_v0 }
  0x76   :  { %1341 = vmatprep.subr.bf16.mxu1 %v1645_v44 }
  0x77   :  { %1280 = vmatpush3.bf16.msra.mxu0 %v1467_v48 }
  0x78   :  { %1281 = vmatprep.subr.bf16.mxu0 %v1468_v49 }
  0x79   :  { %1342 = vmatpush3.bf16.msra.mxu1 %v1478_v1 }
  0x7a   :  { %1343 = vmatprep.subr.bf16.mxu1 %v1645_v44 }
  0x7b   :  { %1282 = vmatpush3.bf16.msra.mxu0 %v1469_v50 }
  0x7c   :  { %1283 = vmatprep.subr.bf16.mxu0 %v1470_v51 }
  0x7d   :  { %1344 = vmatpush3.bf16.msra.mxu1 %v1479_v2 }
  0x7e   :  { %1345 = vmatprep.subr.bf16.mxu1 %v1645_v44 }
  0x7f   :  { %1284 = vmatpush3.bf16.msra.mxu0 %v1471_v52 }
  0x80   :  { %1285 = vmatprep.subr.bf16.mxu0 %v1472_v55  ;;  %v1497_v55 = vld [vmem:[#allocation8 + $0x20] sm:$0xff]  }
  0x81   :  { %1346 = vmatpush3.bf16.msra.mxu1 %v1480_v3 }
  0x82   :  { %1347 = vmatprep.subr.bf16.mxu1 %v1645_v44 }
  0x83   :  { %1286 = vmatpush3.bf16.msra.mxu0 %v1473_v59  ;;  %v1501_v59 = vld [vmem:[%s1887_s9] sm:$0xff]  }
  0x84   :  { %1287 = vmatprep.subr.bf16.mxu0 %v1474_v60  ;;  %v1502_v60 = vld [vmem:[%s1887_s9 + $0x8] sm:$0xff]  }
  0x85   :  { %1348 = vmatpush3.bf16.msra.mxu1 %v1481_v4 }
  0x86   :  { %1349 = vmatprep.subr.bf16.mxu1 %v1645_v44 }
  0x87   :  { %1288 = vmatpush3.bf16.msra.mxu0 %v1475_v61  ;;  %v1503_v61 = vld [vmem:[%s1887_s9 + $0x10] sm:$0xff]  }
  0x88   :  { %1359 = vmatprep.subr.bf16.mxu0 %v1645_v44 }
  0x89   :  { %1350 = vmatpush3.bf16.msra.mxu1 %v1482_v5 }
  0x8a   :  { %620 = vmatmul.mubr.bf16.vlgmr.msra.gmra.mrb[4].mxu0 %v101_v63  ;;  %1351 = vmatprep.subr.bf16.mxu1 %v1645_v44  ;;  %v1203_v63 = vld [vmem:[%s1884_s6] ss:$0 sm:$0xff] }
  0x8b   :  { %1375 = vmatprep.mubr.msk.bf16.mxu0 %vm1646_vm0, %v1645_v44  ;;  %1360 = vmatpush3.bf16.msra.mxu0 %v1485_v8  ;;  %v1506_v8 = vld [vmem:[%s1887_s9 + $0x28] sm:$0xff]  }
  0x8c   :  { %1361 = vmatprep.subr.bf16.mxu0 %v1645_v44 }
  0x8d   :  { %1352 = vmatpush3.bf16.msra.mxu1 %v1483_v6 }
  0x8e   :  { %1353 = vmatprep.subr.bf16.mxu1 %v1645_v44 }
  0x8f   :  { %1362 = vmatpush3.bf16.msra.mxu0 %v1486_v9  ;;  %v1507_v9 = vld [vmem:[%s1887_s9 + $0x30] sm:$0xff]  }
  0x90   :  { %1363 = vmatprep.subr.bf16.mxu0 %v1645_v44 }
  0x91   :  { %1354 = vmatpush3.bf16.msra.mxu1 %v1484_v7  ;;  %v1505_v7 = vld [vmem:[%s1887_s9 + $0x20] sm:$0xff]  }
  0x92   :  { %1379 = vmatprep.subr.bf16.mxu1 %v1645_v44 }
  0x93   :  { %1364 = vmatpush3.bf16.msra.mxu0 %v1487_v10  ;;  %v1508_v10 = vld [vmem:[%s1887_s9 + $0x38] sm:$0xff]  }
  0x94   :  { %1365 = vmatprep.subr.bf16.mxu0 %v1645_v44 }
  0x97   :  { %1366 = vmatpush3.bf16.msra.mxu0 %v1488_v11  ;;  %v1212_v11 = vld [vmem:[%s1886_s8] ss:$0 sm:$0xff]  ;;  %s1647_s8 = smov [#allocation10]  }
  0x98   :  { %1367 = vmatprep.subr.bf16.mxu0 %v1645_v44  ;;  %s1132_s9 = sshll.u32 %s1647_s8, 4  ;;  %s1133_s9 = int_to_ptr.vmem [resolvable:$true] %s1132_s9 }
  0x99   :  { %s1609_s12 = scalar_lea.vmem %s1133_s9, 128  ;;  %p1614_p5 = scmp.lt.s32.totalorder %s1133_s9, %s1133_s9 }
  0x9a   :  { %p1610_p4 = scmp.ne.s32.totalorder %s1133_s9, %s1609_s12  ;;  %p1615_p6 = scmp.lt.s32.totalorder %s1609_s12, %s1609_s12 }
  0x9b   :  { %1368 = vmatpush3.bf16.msra.mxu0 %v1489_v38 }
  0x9c   :  { %1369 = vmatprep.subr.bf16.mxu0 %v1645_v44  ;;  %p1616_p7 = por %p1615_p6, %p1614_p5 }
  0x9e   :  { %p1617_p8 = pnand %p1616_p7, %p1610_p4 }
  0x9f   :  { %1370 = vmatpush3.bf16.msra.mxu0 %v1490_v39 }
  0xa0   :  { %1371 = vmatprep.subr.bf16.mxu0 %v1645_v44 }
  0xa3   :  { %1372 = vmatpush3.bf16.msra.mxu0 %v1491_v40 }
  0xa4   :  { %1373 = vmatprep.subr.bf16.mxu0 %v1645_v44 }
  0xa7   :  { %1374 = vmatpush3.bf16.msra.mxu0 %v1492_v41 }
  0xa8   :  { %1399 = vmatprep.subr.bf16.mxu0 %v1645_v44 }
 0x13d   :  { %v1245_v12 = vpop.f32.mrb[0].mxu0 }
 0x13e   :  { %v1246_v14 = vpop.f32.mrb[1].mxu0 }
 0x13f   :  { %v1247_v15 = vadd.f32 %v1246_v14, %v1245_v12  ;;  %v1248_v16 = vpop.f32.mrb[2].mxu0  ;;  %v1267_v17 = vpop.f32.mrb[0].mxu1 }
 0x140   :  { %v1249_v18 = vpop.f32.mrb[3].mxu0  ;;  %v1268_v20 = vpop.f32.mrb[1].mxu1 }
 0x141   :  { %v542_v19 = vadd.f32 %v1247_v15, %v1143_v13  ;;  %v1269_v21 = vadd.f32 %v1268_v20, %v1267_v17  ;;  %v1270_v22 = vpop.f32.mrb[2].mxu1 }
 0x142   :  { %v1271_v23 = vpop.f32.mrb[3].mxu1 }
 0x143   :  { %v582_v24 = vadd.f32 %v1269_v21, %v542_v19 }
 0x147   :  { %v661_v25 = vpop.f32.mrb[4].mxu1 }
 0x148   :  { %v1337_v26 = vpop.f32.mrb[5].mxu1 }
 0x149   :  { %v664_v27 = vpop.f32.mrb[6].mxu1 }
 0x14a   :  { %v1338_v28 = vpop.f32.mrb[7].mxu1 }
 0x15d   :  { %v1289_v29 = vpop.f32.mrb[4].mxu0 }
 0x15e   :  { %v1290_v30 = vpop.f32.mrb[5].mxu0 }
 0x15f   :  { %v1291_v31 = vadd.f32 %v1290_v30, %v1289_v29  ;;  %v1292_v32 = vpop.f32.mrb[6].mxu0 }
 0x160   :  { %v1293_v33 = vpop.f32.mrb[7].mxu0 }
 0x161   :  { %v622_v34 = vadd.f32 %v1291_v31, %v582_v24 }
 0x163   :  { %v662_v35 = vadd.f32 %v661_v25, %v622_v34 }
 0x165   :  { %1509 = vtanh.f32 %v662_v35 }
 0x16f   :  { %v1510_v36 = vpop.eup %1509 }
 0x170   :  { %v668_v37 = vpack.c.bf16 %v1510_v36, %v1510_v36 }
 0x172   :  { %1356 = vmatmul.mubr.bf16.vlgmr.msra.gmra.mrb[8].mxu1 %v668_v37 }
 0x173   :  { %1395 = vmatprep.mubr.msk.bf16.mxu1 %vm1646_vm0, %v1645_v44  ;;  %1380 = vmatpush3.bf16.msra.mxu1 %v1493_v42 }
 0x174   :  { %1381 = vmatprep.subr.bf16.mxu1 %v1645_v44 }
 0x177   :  { %1382 = vmatpush3.bf16.msra.mxu1 %v1494_v43 }
 0x178   :  { %1383 = vmatprep.subr.bf16.mxu1 %v1645_v44 }
 0x17b   :  { %1384 = vmatpush3.bf16.msra.mxu1 %v1495_v45 }
 0x17c   :  { %1385 = vmatprep.subr.bf16.mxu1 %v1645_v44 }
 0x17f   :  { %1386 = vmatpush3.bf16.msra.mxu1 %v1496_v46 }
 0x180   :  { %1387 = vmatprep.subr.bf16.mxu1 %v1645_v44 }
 0x183   :  { %1388 = vmatpush3.bf16.msra.mxu1 %v1497_v55 }
 0x184   :  { %1389 = vmatprep.subr.bf16.mxu1 %v1645_v44 }
 0x187   :  { %1390 = vmatpush3.bf16.msra.mxu1 %v1498_v56 }
 0x188   :  { %1391 = vmatprep.subr.bf16.mxu1 %v1645_v44 }
 0x18b   :  { %1392 = vmatpush3.bf16.msra.mxu1 %v1499_v57 }
 0x18c   :  { %1393 = vmatprep.subr.bf16.mxu1 %v1645_v44 }
 0x18f   :  { %1394 = vmatpush3.bf16.msra.mxu1 %v1500_v58 }
 0x245   :  { %v774_v48 = vpop.f32.mrb[8].mxu1 }
 0x246   :  { %v775_v49 = vadd.f32 %v1194_v47, %v774_v48  ;;  %v1357_v50 = vpop.f32.mrb[9].mxu1 }
 0x247   :  { %v777_v51 = vpop.f32.mrb[10].mxu1 }
 0x248   :  { %1511 = vtanh.f32 %v775_v49  ;;  %v1358_v52 = vpop.f32.mrb[11].mxu1 }
 0x252   :  { %v1512_v53 = vpop.eup %1511 }
 0x253   :  { %v781_v54 = vpack.c.bf16 %v1512_v53, %v1512_v53 }
 0x255   :  { %1376 = vmatmul.mubr.bf16.vlgmr.msra.gmra.mrb[8].mxu0 %v781_v54 }
 0x256   :  { %1415 = vmatprep.mubr.msk.bf16.mxu0 %vm1646_vm0, %v1645_v44  ;;  %1400 = vmatpush3.bf16.msra.mxu0 %v1501_v59 }
 0x257   :  { %1401 = vmatprep.subr.bf16.mxu0 %v1645_v44 }
 0x25a   :  { %1402 = vmatpush3.bf16.msra.mxu0 %v1502_v60 }
 0x25b   :  { %1403 = vmatprep.subr.bf16.mxu0 %v1645_v44 }
 0x25e   :  { %1404 = vmatpush3.bf16.msra.mxu0 %v1503_v61 }
 0x25f   :  { %1405 = vmatprep.subr.bf16.mxu0 %v1645_v44 }
 0x262   :  { %1406 = vmatpush3.bf16.msra.mxu0 %v1504_v62 }
 0x263   :  { %1407 = vmatprep.subr.bf16.mxu0 %v1645_v44 }
 0x266   :  { %1408 = vmatpush3.bf16.msra.mxu0 %v1505_v7 }
 0x267   :  { %1409 = vmatprep.subr.bf16.mxu0 %v1645_v44 }
 0x26a   :  { %1410 = vmatpush3.bf16.msra.mxu0 %v1506_v8 }
 0x26b   :  { %1411 = vmatprep.subr.bf16.mxu0 %v1645_v44 }
 0x26e   :  { %1412 = vmatpush3.bf16.msra.mxu0 %v1507_v9 }
 0x26f   :  { %1413 = vmatprep.subr.bf16.mxu0 %v1645_v44 }
 0x272   :  { %1414 = vmatpush3.bf16.msra.mxu0 %v1508_v10 }
 0x328   :  { %v887_v0 = vpop.f32.mrb[8].mxu0 }
 0x329   :  { %v888_v1 = vadd.f32 %v1203_v63, %v887_v0  ;;  %v1377_v2 = vpop.f32.mrb[9].mxu0 }
 0x32a   :  { %v890_v3 = vpop.f32.mrb[10].mxu0 }
 0x32b   :  { %1513 = vtanh.f32 %v888_v1  ;;  %v1378_v4 = vpop.f32.mrb[11].mxu0 }
 0x335   :  { %v1514_v5 = vpop.eup %1513 }
 0x336   :  { %v894_v6 = vpack.c.bf16 %v1514_v5, %v1514_v5 }
 0x338   :  { %1396 = vmatmul.mubr.bf16.vlgmr.msra.gmra.mrb[12].mxu1 %v894_v6 }
 0x40b   :  { %v1000_v12 = vpop.f32.mrb[12].mxu1 }
 0x40c   :  { %v1001_v13 = vadd.f32 %v1212_v11, %v1000_v12  ;;  %v1397_v14 = vpop.f32.mrb[13].mxu1 }
 0x40d   :  { %v1003_v15 = vpop.f32.mrb[14].mxu1 }
 0x40e   :  { %1515 = vtanh.f32 %v1001_v13  ;;  %v1398_v16 = vpop.f32.mrb[15].mxu1 }
 0x418   :  { %v1516_v17 = vpop.eup %1515 }
 0x419   :  { %v1007_v18 = vpack.c.bf16 %v1516_v17, %v1516_v17 }
 0x41b   :  { %1416 = vmatmul.mubr.bf16.vlgmr.msra.gmra.mrb[12].mxu0 %v1007_v18 }
 0x4ee   :  { %v1106_v44 = vpop.f32.mrb[12].mxu0 }
 0x4ef   :  { %v1417_v19 = vpop.f32.mrb[13].mxu0  ;;  %v1113_v20 = vsel %vm1112_vm2, %v1106_v44, -inf }
 0x4f0   :  { %1114 = vmax.xlane.f32.xlu0 %v1113_v20  ;;  %v1109_v21 = vpop.f32.mrb[14].mxu0 }
 0x4f1   :  { %v1418_v22 = vpop.f32.mrb[15].mxu0 }
 0x57d   :  { %v1115_v23 = vpop.xlane.xlu0 %1114 }
 0x57e   :  { %v1116_v24 = vsub.f32 %v1106_v44, %v1115_v23 }
 0x580   :  { %v1117_v25 = vmul.f32 1.442695, %v1116_v24 }
 0x582   :  { %1517 = vpow2.f32 %v1117_v25 }
 0x58c   :  { %v1518_v26 = vpop.eup %1517 }
 0x58d   :  { %v1119_v27 = vsel %vm1112_vm2, %v1518_v26, 0.0 }
 0x58e   :  { %1120 = vadd.xlane.f32.xlu0 %v1119_v27 }
 0x61b   :  { %v1121_v28 = vpop.xlane.xlu0 %1120 }
 0x61c   :  { %1519 = vlog2.f32 %v1121_v28 }
 0x626   :  { %v1520_v29 = vpop.eup %1519 }
 0x627   :  { %v1123_v30 = vmul.f32 0.6931472, %v1520_v29 }
 0x629   :  { %v1124_v31 = vsub.f32 %v1116_v24, %v1123_v30 }
 0x62b   :  { %1125 = vst.msk [vmem:[#allocation10] sm:$0xff] %vm1112_vm2, %v1124_v31 }
 0x62c   :  { %1620 = shalt.err (!%p1617_p8)
}
 0x62d   :  { %s1621_s16 = scalar_lea.hbm %s1888_s10, 128 }
 0x62e   :  { %p1622_p9 = scmp.ne.s32.totalorder %s1888_s10, %s1621_s16  ;;  %p1625_p10 = scmp.lt.u32.totalorder %s1621_s16, %s1888_s10 }
 0x630   :  { %p1627_p11 = pnand %p1625_p10, %p1622_p9 }
 0x632   :  { %1630 = shalt.err (!%p1627_p11)
}
 0x633   :  { %1135 = dma.vmem_to_hbm [thread:$0]  %s1133_s9, 128, %s1888_s10, [#allocation4]  }
 0x634   :  { %1637 = dma.done.wait [#allocation4], 128  }
 0x635   :  { %1638 = vsyncadd [#allocation4], 4294967168 }
 0x636   :  { %1139 = vsyncpa [#allocation3], 1 }
 0x637   :  { %1140 = vsyncpa [#allocation6], 1 }
 0x638   :  { %1141 = vsyncpa [#allocation9], 1 }
 0x639   :  { %1142 = vsyncpa [#allocation4], 1 }

</bundles_post_ra>
